<compile_context>
chip_gen: v6e
topology: v6e:2x2x1
jax: 0.10.0
libtpu: 0.0.40
codegen_flags: <defaults>
</compile_context>

<pallas_src>
import functools

import numpy as np
import jax
import jax.numpy as jnp
from jax.experimental import pallas as pl
from jax.experimental.pallas import tpu as pltpu


def _round_up(v, m):
    return ((v + m - 1) // m) * m


# ----------------------------------------------------------------------------
# Pallas kernel: replicate-padded 'default' gradients + single-pass NCC
# ----------------------------------------------------------------------------
def _gc_kernel(x_ref, y_ref, out_ref, acc_ref, *, h, w, eps, n_valid, nb, bpc):
    L = h * w
    c = pl.program_id(0)               # TensorCore split ("parallel")
    i = pl.program_id(1)               # streaming block axis ("arbitrary")
    last = pl.num_programs(1) - 1

    x = x_ref[...].astype(jnp.float32)             # (nb, L)
    y = y_ref[...].astype(jnp.float32)

    lane = jax.lax.broadcasted_iota(jnp.int32, (nb, L), 1)
    row_first = lane < w
    row_last = lane >= (L - w)
    col = lane % w
    col_first = col == 0
    col_last = col == (w - 1)

    use_roll = (L % 128) == 0     # lane rotation wants a 128-multiple lane extent

    def circ_shift(img, s):
        # circular shift: result[k] = img[(k + s) % L]
        s = s % L
        if s == 0:
            return img
        if use_roll:
            return pltpu.roll(img, L - s, axis=1)            # np.roll semantics
        return jnp.concatenate([img[:, s:], img[:, :s]], axis=1)

    def grad_abs(img, direction):
        # 'default' 3x3 gradient kernels with replicate padding:
        #   grad_u[r,c] = img[min(r+1,H-1),c] - img[max(r-1,0),c]
        #   grad_v[r,c] = img[r,min(c+1,W-1)] - img[r,max(c-1,0)]
        if direction == "u":
            nxt = circ_shift(img, w)
            prv = circ_shift(img, L - w)
            g = jnp.where(row_last, img, nxt) - jnp.where(row_first, img, prv)
        else:
            nxt = circ_shift(img, 1)
            prv = circ_shift(img, L - 1)
            g = jnp.where(col_last, img, nxt) - jnp.where(col_first, img, prv)
        return jnp.abs(g)

    inv_l = jnp.float32(1.0 / L)
    eps_f = jnp.float32(eps)

    def ncc(a, b):
        # single-pass per-image NCC; images live on the sublane axis
        sa = jnp.sum(a, axis=1, keepdims=True)
        sb = jnp.sum(b, axis=1, keepdims=True)
        sab = jnp.sum(a * b, axis=1, keepdims=True)
        saa = jnp.sum(a * a, axis=1, keepdims=True)
        sbb = jnp.sum(b * b, axis=1, keepdims=True)
        dev_xy = sab - sa * sb * inv_l
        dev_xx = jnp.maximum(saa - sa * sa * inv_l, 0.0)
        dev_yy = jnp.maximum(sbb - sb * sb * inv_l, 0.0)
        den = jnp.sqrt(dev_xx * dev_yy) + eps_f
        return (dev_xy + eps_f) * pl.reciprocal(den, approx=True)   # (nb, 1)

    # one gradient direction at a time keeps the live f32 planes small
    ncc_uv = (ncc(grad_abs(x, "u"), grad_abs(y, "u"))
              + ncc(grad_abs(x, "v"), grad_abs(y, "v")))            # (nb, 1)

    # mask batch-padding rows (zeros would otherwise contribute eps/eps = 1)
    row0 = (c * bpc + i) * nb
    img_idx = row0 + jax.lax.broadcasted_iota(jnp.int32, (nb, 1), 0)
    contrib = jnp.where(img_idx < n_valid, ncc_uv, 0.0)

    @pl.when(i == 0)
    def _():
        acc_ref[...] = jnp.zeros_like(acc_ref)

    # per-sublane partials; no per-step cross-sublane reduce / scalar RMW chain
    acc_ref[...] += contrib

    @pl.when(i == last)
    def _():
        total = jnp.sum(acc_ref[...], keepdims=True)                # (1, 1)
        out_ref[...] = jnp.broadcast_to(total.reshape(1, 1, 1), out_ref.shape)


def gradient_correlation_2d(x, y, eps=1e-8):
    """Forward pass of GradientCorrelation2d (default args). Returns a scalar."""
    # gauss_sigma=None and crop_quarters=False (defaults) -> those branches are
    # no-ops for this module configuration.
    # TODO(synk): Gaussian pre-smoothing / crop_quarters / sobel-style gradient
    # kernels are not wired up (only grad_method='default').
    if x.shape[1] != y.shape[1]:
        x = jnp.mean(x, axis=1, keepdims=True)
        y = jnp.mean(y, axis=1, keepdims=True)

    b, ch, h, w = x.shape
    n = b * ch
    L = h * w

    # DMA in the native dtype (no wrapper-side f32 copy for bf16 inputs).
    dt = np.dtype(jnp.promote_types(x.dtype, y.dtype))
    if dt.name not in ("float32", "bfloat16"):
        dt = np.dtype(np.float32)
    itemsize = dt.itemsize
    xr = x.reshape(n, L).astype(dt)
    yr = y.reshape(n, L).astype(dt)

    sub = 8 if itemsize == 4 else 16      # sublane packing (f32 / bf16)
    NC = 2                                # "parallel" core axis (v7x megacore)

    try:
        vmem_cap = int(pltpu.get_tpu_info().vmem_capacity_bytes)
    except Exception:
        vmem_cap = 64 * 1024 * 1024       # conservative (v7x per-core VMEM)

    # Generation-aware block budget: 2 inputs x 2 pipeline buffers (native dtype)
    # plus ~8 live f32 planes of in-kernel temporaries per block.
    vmem_target = min(int(vmem_cap * 0.7), 48 * 1024 * 1024)
    per_row_bytes = 4 * L * itemsize + 8 * L * 4
    nb_cap = max(sub, (vmem_target // per_row_bytes) // sub * sub)

    # Minimal batch padding (multiple of sub * NC); choose the block height as a
    # divisor of the per-core rows so no large zero-pad concatenate is needed.
    n_pad = _round_up(n, sub * NC)
    rows_per_core = n_pad // NC
    if rows_per_core <= nb_cap:
        nb = rows_per_core
    else:
        m = rows_per_core // sub
        cap_d = max(1, nb_cap // sub)
        d = 1
        for k in range(cap_d, 0, -1):
            if m % k == 0:
                d = k
                break
        nb = d * sub
        if 4 * nb < nb_cap:
            # pathological divisor (prime-ish row count): pad up to big blocks
            nb = nb_cap
            rows_per_core = _round_up(rows_per_core, nb)
            n_pad = rows_per_core * NC
    bpc = rows_per_core // nb

    if n_pad != n:
        pad = jnp.zeros((n_pad - n, L), dt)
        xr = jnp.concatenate([xr, pad], axis=0)
        yr = jnp.concatenate([yr, pad], axis=0)

    block_in_bytes = nb * L * itemsize
    est_need = 4 * block_in_bytes + 8 * nb * L * 4 + 4 * nb + 64 * 1024
    vmem_limit = int(min(vmem_cap * 0.9,
                         max(32 * 1024 * 1024, est_need + 4 * 1024 * 1024)))

    kernel = functools.partial(_gc_kernel, h=h, w=w, eps=float(eps),
                               n_valid=n, nb=nb, bpc=bpc)
    cost = pl.CostEstimate(flops=int(40 * n * L),
                           transcendentals=int(4 * n),
                           bytes_accessed=int(2 * n * L * itemsize
                                              + NC * 8 * 128 * 4))

    partials = pl.pallas_call(
        kernel,
        out_shape=jax.ShapeDtypeStruct((NC, 8, 128), jnp.float32),
        grid_spec=pltpu.PrefetchScalarGridSpec(
            num_scalar_prefetch=0,
            grid=(NC, bpc),
            in_specs=[pl.BlockSpec((nb, L), lambda c, i: (c * bpc + i, 0)),
                      pl.BlockSpec((nb, L), lambda c, i: (c * bpc + i, 0))],
            out_specs=pl.BlockSpec((1, 8, 128), lambda c, i: (c, 0, 0)),
            scratch_shapes=[pltpu.VMEM((nb, 1), jnp.float32)]),
        compiler_params=pltpu.CompilerParams(
            dimension_semantics=("parallel", "arbitrary"),
            vmem_limit_bytes=vmem_limit),
        cost_estimate=cost,
    )(xr, yr)

    # per-core partial sums -> final reduction + scaling in plain JAX
    total = jnp.sum(partials[:, 0, 0])
    return jnp.float32(1.0) - jnp.float32(0.5 / n) * total


# ----------------------------------------------------------------------------
# Pure-JAX reference (mirrors the PyTorch semantics) for a sanity check
# ----------------------------------------------------------------------------
def _reference_forward(x, y, eps=1e-8):
    b, c, h, w = x.shape
    xr = x.reshape(b * c, h, w).astype(jnp.float32)
    yr = y.reshape(b * c, h, w).astype(jnp.float32)

    def grad(a, axis):
        ap = jnp.pad(a, ((0, 0), (1, 1), (1, 1)), mode="edge")
        if axis == 0:   # grad_u
            return ap[:, 2:, 1:-1] - ap[:, :-2, 1:-1]
        return ap[:, 1:-1, 2:] - ap[:, 1:-1, :-2]

    def ncc(a, bb):
        af = a.reshape(a.shape[0], -1)
        bf = bb.reshape(bb.shape[0], -1)
        af = af - af.mean(axis=1, keepdims=True)
        bf = bf - bf.mean(axis=1, keepdims=True)
        num = (af * bf).sum(axis=1) + eps
        den = jnp.sqrt((af * af).sum(axis=1) * (bf * bf).sum(axis=1)) + eps
        return jnp.mean(num / den)

    xu, xv = jnp.abs(grad(xr, 0)), jnp.abs(grad(xr, 1))
    yu, yv = jnp.abs(grad(yr, 0)), jnp.abs(grad(yr, 1))
    return 1.0 - 0.5 * (ncc(xu, yu) + ncc(xv, yv))


if __name__ == "__main__":
    key = jax.random.PRNGKey(0)
    kx, ky = jax.random.split(key)
    B, C, H, W = 2, 4, 16, 16
    x = jax.random.normal(kx, (B, C, H, W), dtype=jnp.float32)
    y = jax.random.normal(ky, (B, C, H, W), dtype=jnp.float32)

    out = gradient_correlation_2d(x, y)
    out = jax.block_until_ready(out)

    ref = _reference_forward(x, y)
    np.testing.assert_allclose(np.asarray(out), np.asarray(ref),
                               rtol=1e-3, atol=1e-3)
    print("KERNEL_OK")
</pallas_src>

<mosaic_0001>
module attributes {stable_mosaic.version = 11 : i64} {
  func.func @_gc_kernel(%arg0: i32, %arg1: i32, %arg2: memref<8x256xf32, #tpu.memory_space<vmem>>, %arg3: memref<8x256xf32, #tpu.memory_space<vmem>>, %arg4: memref<1x8x128xf32, #tpu.memory_space<vmem>>, %arg5: memref<8x1xf32, #tpu.memory_space<vmem>>) attributes {dimension_semantics = [#tpu.dimension_semantics<parallel>, #tpu.dimension_semantics<arbitrary>], iteration_bounds = array<i64: 2, 1>, scalar_prefetch = 0 : i64, scratch_operands = 1 : i64, tpu.core_type = #tpu.core_type<tc>, window_params = [{transform_indices = @transform_0, window_bounds = array<i64: 8, 256>}, {transform_indices = @transform_1, window_bounds = array<i64: 8, 256>}, {transform_indices = @transform_2, window_bounds = array<i64: 1, 8, 128>}]} {
    %c0 = arith.constant 0 : index
    %c0_0 = arith.constant 0 : index
    %0 = vector.load %arg2[%c0, %c0_0] : memref<8x256xf32, #tpu.memory_space<vmem>>, vector<8x256xf32>
    %c0_1 = arith.constant 0 : index
    %c0_2 = arith.constant 0 : index
    %1 = vector.load %arg3[%c0_1, %c0_2] : memref<8x256xf32, #tpu.memory_space<vmem>>, vector<8x256xf32>
    %2 = tpu.iota {dimensions = array<i32: 1>} : vector<8x256xi32>
    %c16_i32 = arith.constant 16 : i32
    %3 = vector.broadcast %c16_i32 : i32 to vector<8x256xi32>
    %4 = arith.cmpi slt, %2, %3 : vector<8x256xi32>
    %c240_i32 = arith.constant 240 : i32
    %5 = vector.broadcast %c240_i32 : i32 to vector<8x256xi32>
    %6 = arith.cmpi sge, %2, %5 : vector<8x256xi32>
    %c16_i32_3 = arith.constant 16 : i32
    %c0_i32 = arith.constant 0 : i32
    %7 = arith.cmpi eq, %c16_i32_3, %c0_i32 : i32
    %c1_i32 = arith.constant 1 : i32
    %8 = arith.select %7, %c1_i32, %c16_i32_3 : i32
    %9 = vector.broadcast %8 : i32 to vector<8x256xi32>
    %10 = arith.remsi %2, %9 : vector<8x256xi32>
    %c0_i32_4 = arith.constant 0 : i32
    %11 = vector.broadcast %c0_i32_4 : i32 to vector<8x256xi32>
    %12 = arith.cmpi ne, %10, %11 : vector<8x256xi32>
    %c0_i32_5 = arith.constant 0 : i32
    %13 = vector.broadcast %c0_i32_5 : i32 to vector<8x256xi32>
    %14 = arith.cmpi slt, %10, %13 : vector<8x256xi32>
    %c0_i32_6 = arith.constant 0 : i32
    %15 = arith.cmpi slt, %8, %c0_i32_6 : i32
    %16 = vector.broadcast %15 : i1 to vector<8x256xi1>
    %17 = vector.broadcast %16 : vector<8x256xi1> to vector<8x256xi1>
    %18 = arith.xori %14, %17 : vector<8x256xi1>
    %19 = arith.andi %18, %12 : vector<8x256xi1>
    %20 = vector.broadcast %8 : i32 to vector<8x256xi32>
    %21 = arith.addi %10, %20 : vector<8x256xi32>
    %22 = arith.select %19, %21, %10 : vector<8x256xi1>, vector<8x256xi32>
    %c0_i32_7 = arith.constant 0 : i32
    %23 = vector.broadcast %c0_i32_7 : i32 to vector<8x256xi32>
    %24 = arith.cmpi eq, %22, %23 : vector<8x256xi32>
    %c15_i32 = arith.constant 15 : i32
    %25 = vector.broadcast %c15_i32 : i32 to vector<8x256xi32>
    %26 = arith.cmpi eq, %22, %25 : vector<8x256xi32>
    %c240_i32_8 = arith.constant 240 : i32
    %27 = tpu.dynamic_rotate %0 by %c240_i32_8 dim 1 : vector<8x256xf32>, i32 -> vector<8x256xf32>
    %c16_i32_9 = arith.constant 16 : i32
    %28 = tpu.dynamic_rotate %0 by %c16_i32_9 dim 1 : vector<8x256xf32>, i32 -> vector<8x256xf32>
    %29 = arith.select %6, %0, %27 : vector<8x256xi1>, vector<8x256xf32>
    %30 = arith.select %4, %0, %28 : vector<8x256xi1>, vector<8x256xf32>
    %31 = arith.subf %29, %30 : vector<8x256xf32>
    %32 = math.absf %31 : vector<8x256xf32>
    %c240_i32_10 = arith.constant 240 : i32
    %33 = tpu.dynamic_rotate %1 by %c240_i32_10 dim 1 : vector<8x256xf32>, i32 -> vector<8x256xf32>
    %c16_i32_11 = arith.constant 16 : i32
    %34 = tpu.dynamic_rotate %1 by %c16_i32_11 dim 1 : vector<8x256xf32>, i32 -> vector<8x256xf32>
    %35 = arith.select %6, %1, %33 : vector<8x256xi1>, vector<8x256xf32>
    %36 = arith.select %4, %1, %34 : vector<8x256xi1>, vector<8x256xf32>
    %37 = arith.subf %35, %36 : vector<8x256xf32>
    %38 = math.absf %37 : vector<8x256xf32>
    %cst = arith.constant dense<0.000000e+00> : vector<8xf32>
    %39 = vector.multi_reduction <add>, %32, %cst [1] : vector<8x256xf32> to vector<8xf32>
    %40 = vector.shape_cast %39 : vector<8xf32> to vector<8x1xf32>
    %cst_12 = arith.constant dense<0.000000e+00> : vector<8xf32>
    %41 = vector.multi_reduction <add>, %38, %cst_12 [1] : vector<8x256xf32> to vector<8xf32>
    %42 = vector.shape_cast %41 : vector<8xf32> to vector<8x1xf32>
    %43 = arith.mulf %32, %38 : vector<8x256xf32>
    %cst_13 = arith.constant dense<0.000000e+00> : vector<8xf32>
    %44 = vector.multi_reduction <add>, %43, %cst_13 [1] : vector<8x256xf32> to vector<8xf32>
    %45 = vector.shape_cast %44 : vector<8xf32> to vector<8x1xf32>
    %46 = arith.mulf %32, %32 : vector<8x256xf32>
    %cst_14 = arith.constant dense<0.000000e+00> : vector<8xf32>
    %47 = vector.multi_reduction <add>, %46, %cst_14 [1] : vector<8x256xf32> to vector<8xf32>
    %48 = vector.shape_cast %47 : vector<8xf32> to vector<8x1xf32>
    %49 = arith.mulf %38, %38 : vector<8x256xf32>
    %cst_15 = arith.constant dense<0.000000e+00> : vector<8xf32>
    %50 = vector.multi_reduction <add>, %49, %cst_15 [1] : vector<8x256xf32> to vector<8xf32>
    %51 = vector.shape_cast %50 : vector<8xf32> to vector<8x1xf32>
    %52 = arith.mulf %40, %42 : vector<8x1xf32>
    %cst_16 = arith.constant 3.906250e-03 : f32
    %53 = vector.broadcast %cst_16 : f32 to vector<8x1xf32>
    %54 = arith.mulf %52, %53 : vector<8x1xf32>
    %55 = arith.subf %45, %54 : vector<8x1xf32>
    %56 = arith.mulf %40, %40 : vector<8x1xf32>
    %cst_17 = arith.constant 3.906250e-03 : f32
    %57 = vector.broadcast %cst_17 : f32 to vector<8x1xf32>
    %58 = arith.mulf %56, %57 : vector<8x1xf32>
    %59 = arith.subf %48, %58 : vector<8x1xf32>
    %cst_18 = arith.constant 0.000000e+00 : f32
    %60 = vector.broadcast %cst_18 : f32 to vector<8x1xf32>
    %61 = arith.maximumf %59, %60 : vector<8x1xf32>
    %62 = arith.mulf %42, %42 : vector<8x1xf32>
    %cst_19 = arith.constant 3.906250e-03 : f32
    %63 = vector.broadcast %cst_19 : f32 to vector<8x1xf32>
    %64 = arith.mulf %62, %63 : vector<8x1xf32>
    %65 = arith.subf %51, %64 : vector<8x1xf32>
    %cst_20 = arith.constant 0.000000e+00 : f32
    %66 = vector.broadcast %cst_20 : f32 to vector<8x1xf32>
    %67 = arith.maximumf %65, %66 : vector<8x1xf32>
    %68 = arith.mulf %61, %67 : vector<8x1xf32>
    %69 = math.sqrt %68 : vector<8x1xf32>
    %cst_21 = arith.constant 9.99999993E-9 : f32
    %70 = vector.broadcast %cst_21 : f32 to vector<8x1xf32>
    %71 = arith.addf %69, %70 : vector<8x1xf32>
    %cst_22 = arith.constant 9.99999993E-9 : f32
    %72 = vector.broadcast %cst_22 : f32 to vector<8x1xf32>
    %73 = arith.addf %55, %72 : vector<8x1xf32>
    %74 = tpu.reciprocal %71 {approx = true} : vector<8x1xf32> -> vector<8x1xf32>
    %75 = arith.mulf %73, %74 : vector<8x1xf32>
    %c255_i32 = arith.constant 255 : i32
    %76 = tpu.dynamic_rotate %0 by %c255_i32 dim 1 : vector<8x256xf32>, i32 -> vector<8x256xf32>
    %c1_i32_23 = arith.constant 1 : i32
    %77 = tpu.dynamic_rotate %0 by %c1_i32_23 dim 1 : vector<8x256xf32>, i32 -> vector<8x256xf32>
    %78 = arith.select %26, %0, %76 : vector<8x256xi1>, vector<8x256xf32>
    %79 = arith.select %24, %0, %77 : vector<8x256xi1>, vector<8x256xf32>
    %80 = arith.subf %78, %79 : vector<8x256xf32>
    %81 = math.absf %80 : vector<8x256xf32>
    %c255_i32_24 = arith.constant 255 : i32
    %82 = tpu.dynamic_rotate %1 by %c255_i32_24 dim 1 : vector<8x256xf32>, i32 -> vector<8x256xf32>
    %c1_i32_25 = arith.constant 1 : i32
    %83 = tpu.dynamic_rotate %1 by %c1_i32_25 dim 1 : vector<8x256xf32>, i32 -> vector<8x256xf32>
    %84 = arith.select %26, %1, %82 : vector<8x256xi1>, vector<8x256xf32>
    %85 = arith.select %24, %1, %83 : vector<8x256xi1>, vector<8x256xf32>
    %86 = arith.subf %84, %85 : vector<8x256xf32>
    %87 = math.absf %86 : vector<8x256xf32>
    %cst_26 = arith.constant dense<0.000000e+00> : vector<8xf32>
    %88 = vector.multi_reduction <add>, %81, %cst_26 [1] : vector<8x256xf32> to vector<8xf32>
    %89 = vector.shape_cast %88 : vector<8xf32> to vector<8x1xf32>
    %cst_27 = arith.constant dense<0.000000e+00> : vector<8xf32>
    %90 = vector.multi_reduction <add>, %87, %cst_27 [1] : vector<8x256xf32> to vector<8xf32>
    %91 = vector.shape_cast %90 : vector<8xf32> to vector<8x1xf32>
    %92 = arith.mulf %81, %87 : vector<8x256xf32>
    %cst_28 = arith.constant dense<0.000000e+00> : vector<8xf32>
    %93 = vector.multi_reduction <add>, %92, %cst_28 [1] : vector<8x256xf32> to vector<8xf32>
    %94 = vector.shape_cast %93 : vector<8xf32> to vector<8x1xf32>
    %95 = arith.mulf %81, %81 : vector<8x256xf32>
    %cst_29 = arith.constant dense<0.000000e+00> : vector<8xf32>
    %96 = vector.multi_reduction <add>, %95, %cst_29 [1] : vector<8x256xf32> to vector<8xf32>
    %97 = vector.shape_cast %96 : vector<8xf32> to vector<8x1xf32>
    %98 = arith.mulf %87, %87 : vector<8x256xf32>
    %cst_30 = arith.constant dense<0.000000e+00> : vector<8xf32>
    %99 = vector.multi_reduction <add>, %98, %cst_30 [1] : vector<8x256xf32> to vector<8xf32>
    %100 = vector.shape_cast %99 : vector<8xf32> to vector<8x1xf32>
    %101 = arith.mulf %89, %91 : vector<8x1xf32>
    %cst_31 = arith.constant 3.906250e-03 : f32
    %102 = vector.broadcast %cst_31 : f32 to vector<8x1xf32>
    %103 = arith.mulf %101, %102 : vector<8x1xf32>
    %104 = arith.subf %94, %103 : vector<8x1xf32>
    %105 = arith.mulf %89, %89 : vector<8x1xf32>
    %cst_32 = arith.constant 3.906250e-03 : f32
    %106 = vector.broadcast %cst_32 : f32 to vector<8x1xf32>
    %107 = arith.mulf %105, %106 : vector<8x1xf32>
    %108 = arith.subf %97, %107 : vector<8x1xf32>
    %cst_33 = arith.constant 0.000000e+00 : f32
    %109 = vector.broadcast %cst_33 : f32 to vector<8x1xf32>
    %110 = arith.maximumf %108, %109 : vector<8x1xf32>
    %111 = arith.mulf %91, %91 : vector<8x1xf32>
    %cst_34 = arith.constant 3.906250e-03 : f32
    %112 = vector.broadcast %cst_34 : f32 to vector<8x1xf32>
    %113 = arith.mulf %111, %112 : vector<8x1xf32>
    %114 = arith.subf %100, %113 : vector<8x1xf32>
    %cst_35 = arith.constant 0.000000e+00 : f32
    %115 = vector.broadcast %cst_35 : f32 to vector<8x1xf32>
    %116 = arith.maximumf %114, %115 : vector<8x1xf32>
    %117 = arith.mulf %110, %116 : vector<8x1xf32>
    %118 = math.sqrt %117 : vector<8x1xf32>
    %cst_36 = arith.constant 9.99999993E-9 : f32
    %119 = vector.broadcast %cst_36 : f32 to vector<8x1xf32>
    %120 = arith.addf %118, %119 : vector<8x1xf32>
    %cst_37 = arith.constant 9.99999993E-9 : f32
    %121 = vector.broadcast %cst_37 : f32 to vector<8x1xf32>
    %122 = arith.addf %104, %121 : vector<8x1xf32>
    %123 = tpu.reciprocal %120 {approx = true} : vector<8x1xf32> -> vector<8x1xf32>
    %124 = arith.mulf %122, %123 : vector<8x1xf32>
    %125 = arith.addf %75, %124 : vector<8x1xf32>
    %c1_i32_38 = arith.constant 1 : i32
    %126 = arith.muli %arg0, %c1_i32_38 : i32
    %127 = arith.addi %126, %arg1 : i32
    %c8_i32 = arith.constant 8 : i32
    %128 = arith.muli %127, %c8_i32 : i32
    %129 = tpu.iota {dimensions = array<i32: 0>} : vector<8x1xi32>
    %130 = vector.broadcast %128 : i32 to vector<8x1xi32>
    %131 = arith.addi %130, %129 : vector<8x1xi32>
    %c8_i32_39 = arith.constant 8 : i32
    %132 = vector.broadcast %c8_i32_39 : i32 to vector<8x1xi32>
    %133 = arith.cmpi slt, %131, %132 : vector<8x1xi32>
    %cst_40 = arith.constant 0.000000e+00 : f32
    %134 = vector.broadcast %cst_40 : f32 to vector<8x1xf32>
    %135 = arith.select %133, %125, %134 : vector<8x1xi1>, vector<8x1xf32>
    %c0_i32_41 = arith.constant 0 : i32
    %136 = arith.cmpi eq, %arg1, %c0_i32_41 : i32
    %137 = arith.extui %136 : i1 to i32
    %c0_i32_42 = arith.constant 0 : i32
    %138 = arith.cmpi ne, %137, %c0_i32_42 : i32
    scf.if %138 {
      %cst_49 = arith.constant 0.000000e+00 : f32
      %145 = vector.broadcast %cst_49 : f32 to vector<8x1xf32>
      %c0_50 = arith.constant 0 : index
      %c0_51 = arith.constant 0 : index
      %146 = vector.load %arg5[%c0_50, %c0_51] : memref<8x1xf32, #tpu.memory_space<vmem>>, vector<8x1xf32>
      tpu.vector_store %arg5[%c0_50, %c0_51], %145 {strides = array<i32>} : memref<8x1xf32, #tpu.memory_space<vmem>>, vector<8x1xf32>,
    } else {
    }
    %c0_43 = arith.constant 0 : index
    %c0_44 = arith.constant 0 : index
    %139 = vector.load %arg5[%c0_43, %c0_44] : memref<8x1xf32, #tpu.memory_space<vmem>>, vector<8x1xf32>
    %140 = arith.addf %139, %135 : vector<8x1xf32>
    %c0_45 = arith.constant 0 : index
    %c0_46 = arith.constant 0 : index
    %141 = vector.load %arg5[%c0_45, %c0_46] : memref<8x1xf32, #tpu.memory_space<vmem>>, vector<8x1xf32>
    tpu.vector_store %arg5[%c0_45, %c0_46], %140 {strides = array<i32>} : memref<8x1xf32, #tpu.memory_space<vmem>>, vector<8x1xf32>,
    %c0_i32_47 = arith.constant 0 : i32
    %142 = arith.cmpi eq, %arg1, %c0_i32_47 : i32
    %143 = arith.extui %142 : i1 to i32
    %c0_i32_48 = arith.constant 0 : i32
    %144 = arith.cmpi ne, %143, %c0_i32_48 : i32
    scf.if %144 {
      %c0_49 = arith.constant 0 : index
      %c0_50 = arith.constant 0 : index
      %145 = vector.load %arg5[%c0_49, %c0_50] : memref<8x1xf32, #tpu.memory_space<vmem>>, vector<8x1xf32>
      %146 = vector.shape_cast %145 : vector<8x1xf32> to vector<1x8x1xf32>
      %cst_51 = arith.constant dense<0.000000e+00> : vector<1xf32>
      %147 = vector.multi_reduction <add>, %146, %cst_51 [1, 2] : vector<1x8x1xf32> to vector<1xf32>
      %148 = vector.shape_cast %147 : vector<1xf32> to vector<1x1x1xf32>
      %149 = vector.extract %148[0, 0, 0] : f32 from vector<1x1x1xf32>
      %150 = vector.broadcast %149 : f32 to vector<1x1xf32>
      %151 = vector.shape_cast %150 : vector<1x1xf32> to vector<1x1x1xf32>
      %152 = vector.shape_cast %151 : vector<1x1x1xf32> to vector<1x1x1xf32>
      %153 = vector.broadcast %152 : vector<1x1x1xf32> to vector<1x8x128xf32>
      %c0_52 = arith.constant 0 : index
      %c0_53 = arith.constant 0 : index
      %c0_54 = arith.constant 0 : index
      %154 = vector.load %arg4[%c0_52, %c0_53, %c0_54] : memref<1x8x128xf32, #tpu.memory_space<vmem>>, vector<1x8x128xf32>
      tpu.vector_store %arg4[%c0_52, %c0_53, %c0_54], %153 {strides = array<i32>} : memref<1x8x128xf32, #tpu.memory_space<vmem>>, vector<1x8x128xf32>,
    } else {
    }
    return
  }
  func.func @transform_0(%arg0: i32, %arg1: i32) -> (i32, i32) {
    %c1_i32 = arith.constant 1 : i32
    %0 = arith.muli %arg0, %c1_i32 : i32
    %1 = arith.addi %0, %arg1 : i32
    %c0_i32 = arith.constant 0 : i32
    %c0_i32_0 = arith.constant 0 : i32
    return %1, %c0_i32 : i32, i32
  }
  func.func @transform_1(%arg0: i32, %arg1: i32) -> (i32, i32) {
    %c1_i32 = arith.constant 1 : i32
    %0 = arith.muli %arg0, %c1_i32 : i32
    %1 = arith.addi %0, %arg1 : i32
    %c0_i32 = arith.constant 0 : i32
    %c0_i32_0 = arith.constant 0 : i32
    return %1, %c0_i32 : i32, i32
  }
  func.func @transform_2(%arg0: i32, %arg1: i32) -> (i32, i32, i32) {
    %c0_i32 = arith.constant 0 : i32
    %c0_i32_0 = arith.constant 0 : i32
    %c0_i32_1 = arith.constant 0 : i32
    return %arg0, %c0_i32, %c0_i32_0 : i32, i32, i32
  }
}

</mosaic_0001>

<bundles_post_ra>
// kernel: tpu_custom_call.1
= control target key start
LH: loop header
LB: loop body
LE: loop exit
PB: predicated region body
PF: predicated region fallthrough
CT: control target
= control target key end

     0   :  { %7 = vsyncpa [#allocation4], 0  ;;  %s1136_s0 = inlined_call_operand.hbm [shape: f32[16,256], index: 0, kind: input, shape index: {}]   ;;  %s1137_s1 = inlined_call_operand.hbm [shape: f32[16,256], index: 1, kind: input, shape index: {}]   ;;  %s1138_s2 = inlined_call_operand.hbm [shape: f32[2,8,128], index: 2, kind: output, shape index: {}]  }
   0x1   :  { %9 = vsyncpa [#allocation4 + $0x1], 0 }
   0x2   :  { %10 = vsyncpa [#allocation7], 0 }
   0x3   :  { %12 = vsyncpa [#allocation7 + $0x1], 0 }
   0x4   :  { %13 = vsyncpa [#allocation5], 0 }
   0x5   :  { %15 = vsyncpa [#allocation5 + $0x1], 0  ;;  %s848_s9 = smov 0   ;;  %s850_s10 = smov 0  }
   0x6   :  { %s852_s11 = smov 0   ;;  %s854_s12 = smov 0  }
   0x7   :  { %s856_s13 = smov 0   ;;  %s858_s14 = smov 0  }
   0x8 LB: > { %s580_s15 = sadd.s32 4294967295, %s823_s14   ;;  %s581_s16 = sadd.s32 4294967294, %s823_s14   ;;  %s823_s14 = sphi %s858_s14, %s21_s14   ;;  %s819_s13 = sphi %s856_s13, %s1158_s13   ;;  %s815_s12 = sphi %s854_s12, %s1157_s12   ;;  %s811_s11 = sphi %s852_s11, %s1156_s11   ;;  %s807_s10 = sphi %s850_s10, %s1155_s10   ;;  %s803_s9 = sphi %s848_s9, %s1154_s9  }
   0x9   : > { %s33_s17 = sadd.s32 1, %s819_s13  ;;  %s42_s18 = sadd.s32 1, %s811_s11 }
   0xa   : > { %p35_p0 = scmp.ge.s32.totalorder %s33_s17, 2  ;;  %p49_p1 = scmp.ne.s32.totalorder %s811_s11, %s807_s10 }
   0xb   : > { %p50_p2 = scmp.eq.s32.totalorder %s823_s14, 0  ;;  %p55_p3 = scmp.ne.s32.totalorder %s807_s10, %s803_s9 }
   0xc   : > { %s1160_s17 = smov (%p35_p0, %s33_s17), 0  ;;  %p56_p5 = scmp.eq.s32.totalorder %s580_s15, 0 }
   0xd   : > { %p889_p4 = por %p50_p2, %p49_p1  ;;  %s39_s20 = ssub.s32 %s819_s13, %s1160_s17 }
   0xe   : > { %p107_p6 = scmp.eq.s32.totalorder %s580_s15, 1  ;;  %p40_p7 = scmp.eq.s32.totalorder %s39_s20, 0 }
   0xf   : > { %p895_p8 = por %p56_p5, %p55_p3  ;;  %p113_p10 = scmp.eq.s32.totalorder %s581_s16, 1 }
  0x10   : > { %p899_p9 = por %p107_p6, %p49_p1  ;;  %p620_p13 = scmp.lt.s32.totalorder %s823_s14, 2 }
  0x11   : > { %s904_s23 = scalar_select %p40_p7, %s811_s11, %s42_s18  }
  0x12   : > { %p906_p11 = por %p113_p10, %p55_p3  ;;  %s913_s25 = sand.u32 1, %s811_s11  }
  0x13   : > { %s584_s26 = sshll.u32 %s913_s25, 4  ;;  %s599_s27 = sshll.u32 %s819_s13, 8 }
  0x14   : > { %s144_s30 = scalar_lea.hbm %s1136_s0, %s599_s27  ;;  %s137_s3 = scalar_lea.vmem [#allocation3], %s584_s26 }
  0x15   : > { %s146_s4 = sshll.u32 %s137_s3, 4  ;;  %p922_p0 = pnand %p620_p13, %p889_p4  ;;  %s147_s4 = int_to_ptr.vmem [resolvable:$true] %s146_s4 }
  0x16   : > { %p590_p1 = scmp.ge.s32.totalorder %s823_s14, 1  ;;  %p171_p2 = scmp.lt.s32.totalorder %s823_s14, 3 }
  0x17   : > { %s134_s6 = scalar_lea.sflag [#allocation4], %s913_s25  ;;  %p685_p3 = pneg %p922_p0 }
  0x18   : > { %s696_s7 = scalar_lea.vmem %s147_s4, 256  ;;  %s825_s8 = smov [#allocation3]  }
  0x19   : > { %p697_p5 = scmp.ne.s32.totalorder %s147_s4, %s696_s7  ;;  %s701_s15 = sshll.u32 %s825_s8, 4  ;;  %s702_s15 = int_to_ptr.vmem [resolvable:$false] %s701_s15 }
  0x1a   : > { %s703_s16 = scalar_lea.vmem %s702_s15, 512  ;;  %p704_p4 = scmp.lt.s32.totalorder %s147_s4, %s702_s15 }
  0x1b   : > { %p699_p6 = pnand %p697_p5, %p685_p3  ;;  %p705_p10 = scmp.lt.s32.totalorder %s703_s16, %s696_s7 }
  0x1d   : > { %p700_p7 = pneg %p699_p6  ;;  %p706_p13 = por %p705_p10, %p704_p4 }
  0x1f   : > { %p707_p12 = pnand %p706_p13, %p700_p7 }
  0x21   : > { %710 = shalt.err (!%p707_p12)
}
  0x22   : > { %612 = dma.hbm_to_vmem [thread:$0]  (!%p922_p0), %s144_s30, 256, %s147_s4, %s134_s6  }
  0x23   : > { %p940_p5 = pnand %p590_p1, %p171_p2  ;;  %s164_s28 = scalar_lea.hbm %s1137_s1, %s599_s27 }
  0x24   : > { %s157_s29 = scalar_lea.vmem [#allocation6], %s584_s26  ;;  %s154_s7 = scalar_lea.sflag [#allocation7], %s913_s25 }
  0x25   : > { %s166_s3 = sshll.u32 %s157_s29, 4  ;;  %s826_s30 = smov [#allocation6]   ;;  %s167_s3 = int_to_ptr.vmem [resolvable:$true] %s166_s3 }
  0x26   : > { %s724_s8 = scalar_lea.vmem %s167_s3, 256  ;;  %s729_s4 = sshll.u32 %s826_s30, 4  ;;  %s730_s4 = int_to_ptr.vmem [resolvable:$false] %s729_s4 }
  0x27   : > { %p725_p12 = scmp.ne.s32.totalorder %s167_s3, %s724_s8  ;;  %s731_s6 = scalar_lea.vmem %s730_s4, 512 }
  0x28   : > { %p732_p1 = scmp.lt.s32.totalorder %s167_s3, %s730_s4  ;;  %p733_p2 = scmp.lt.s32.totalorder %s731_s6, %s724_s8 }
  0x29   : > { %p727_p6 = pnand %p725_p12, %p685_p3 }
  0x2a   : > { %p734_p4 = por %p733_p2, %p732_p1 }
  0x2b   : > { %p728_p7 = pneg %p727_p6 }
  0x2d   : > { %p735_p10 = pnand %p734_p4, %p728_p7 }
  0x2f   : > { %738 = shalt.err (!%p735_p10)
}
  0x30   : > { %615 = dma.hbm_to_vmem [thread:$0]  (!%p922_p0), %s164_s28, 256, %s167_s3, %s154_s7  }
  0x31   : > { %175 = sbr.rel (%p940_p5) target bundleno = 625 (0x271), region = 28  ;;  %s956_s25 = sand.u32 (!%p940_p5), 1, %s807_s10  }
  0x32   : > { %s591_s26 = sshll.u32 (!%p940_p5), %s956_s25, 4  ;;  %s178_s27 = scalar_lea.sflag (!%p940_p5), [#allocation4], %s956_s25 }
  0x33   : > { %s181_s15 = scalar_lea.vmem (!%p940_p5), [#allocation3], %s591_s26 }
  0x36   : > { %790 = dma.done.wait (%p895_p8), %s178_s27, 256  }
  0x37   : > { %792 = vsyncadd (%p895_p8), %s178_s27, 4294967040  ;;  %s187_s5 = scalar_lea.sflag [#allocation7], %s956_s25  ;;  %s190_s16 = scalar_lea.vmem [#allocation6], %s591_s26 }
  0x38   : > { %794 = dma.done.wait (%p895_p8), %s187_s5, 256  }
  0x39   : > { %796 = vsyncadd (%p895_p8), %s187_s5, 4294967040  ;;  %v969_v0 = vld [vmem:[%s181_s15] sm:$0xff]  ;;  %s827_s18 = smov 16   ;;  %s828_s19 = smov 112   ;;  %v973_v1 = vld [vmem:[%s181_s15 + $0x8] sm:$0xff]  ;;  %v222_v4 = vlaneseq  ;;  %vm441_vm9 = vcmask 7168  }
  0x3a   : > { %264 = vrot.lane.b32.xlu1 %v969_v0, %s827_s18  ;;  %257 = vrot.lane.b32.xlu0 %v969_v0, %s828_s19  ;;  %v977_v2 = vld [vmem:[%s190_s16 + $0x8] sm:$0xff]  ;;  %v979_v3 = vld [vmem:[%s190_s16] sm:$0xff]  ;;  %s829_s21 = smov 127   ;;  %s830_s20 = smov 1  }
  0x3b   : > { %v994_v5 = vand.u32 127, %v222_v4  ;;  %s594_s28 = sshll.u32 %s815_s12, 3  ;;  %s593_s29 = sshll.u32 %s956_s25, 3 }
  0x3c   : > { %s215_s3 = scalar_lea.vmem [#allocation8], %s593_s29  ;;  %s596_s8 = sshll.u32 %s815_s12, 7 }
  0x3d   : > { %v224_v6 = vadd.s32 128, %v994_v5  ;;  %vm225_vm0 = vcmp.lt.s32.totalorder %v994_v5, 16  ;;  %vm261_vm1 = vcmp.lt.s32.totalorder %v994_v5, 112  ;;  %v233_v27 = vand.u32 15, %v994_v5  ;;  %s477_s7 = sshll.u32 %s215_s3, 4  ;;  %s475_s26 = scalar_lea.hbm %s1138_s2, %s596_s8  ;;  %s1091_s7 = int_to_ptr.vmem [resolvable:$true] %s477_s7 }
  0x3e   : > { %266 = vrot.lane.b32.xlu1 %v973_v1, %s827_s18  ;;  %259 = vrot.lane.b32.xlu0 %v973_v1, %s828_s19  ;;  %vm346_vm3 = vcmp.lt.s32.totalorder %v994_v5, 127  ;;  %vm353_vm8 = vcmp.lt.s32.totalorder %v994_v5, 1  ;;  %s464_s27 = scalar_lea.sflag [#allocation5], %s956_s25  ;;  %s739_s15 = scalar_lea.vmem %s1091_s7, 128 }
  0x3f   : > { %vm228_vm2 = vcmp.ge.s32.totalorder %v224_v6, 240  ;;  %v240_v31 = vand.u32 15, %v224_v6  ;;  %vm1027_vm4 = vcmp.eq.s32.totalorder %v233_v27, 15  ;;  %vm1035_vm6 = vcmp.eq.s32.totalorder %v233_v27, 0  ;;  %p740_p8 = scmp.ne.s32.totalorder %s1091_s7, %s739_s15  ;;  %s832_s5 = smov [#allocation8]  }
  0x40   : > { %s743_s12 = sshll.u32 %s832_s5, 4  ;;  %s744_s12 = int_to_ptr.vmem [resolvable:$false] %s743_s12 }
  0x41   : > { %vm1031_vm5 = vcmp.eq.s32.totalorder %v240_v31, 15  ;;  %vm1039_vm7 = vcmp.eq.s32.totalorder %v240_v31, 0  ;;  %p741_p0 = pnand %p740_p8, %p899_p9  ;;  %s745_s16 = scalar_lea.vmem %s744_s12, 256 }
  0x42   : > { %280 = vrot.lane.b32.xlu1 %v977_v2, %s828_s19  ;;  %278 = vrot.lane.b32.xlu0 %v979_v3, %s828_s19  ;;  %p746_p13 = scmp.lt.s32.totalorder %s1091_s7, %s744_s12  ;;  %p747_p5 = scmp.lt.s32.totalorder %s745_s16, %s739_s15 }
  0x43   : > { %p742_p3 = pneg %p741_p0 }
  0x44   : > { %p748_p12 = por %p747_p5, %p746_p13 }
  0x46   : > { %286 = vrot.lane.b32.xlu1 %v977_v2, %s827_s18  ;;  %284 = vrot.lane.b32.xlu0 %v979_v3, %s827_s18  ;;  %p749_p6 = pnand %p748_p12, %p742_p3 }
  0x4a   : > { %344 = vrot.lane.b32.xlu1 %v973_v1, %s829_s21  ;;  %342 = vrot.lane.b32.xlu0 %v969_v0, %s829_s21 }
  0x4e   : > { %351 = vrot.lane.b32.xlu1 %v973_v1, %s830_s20  ;;  %349 = vrot.lane.b32.xlu0 %v969_v0, %s830_s20 }
  0x52   : > { %366 = vrot.lane.b32.xlu1 %v977_v2, %s829_s21  ;;  %364 = vrot.lane.b32.xlu0 %v979_v3, %s829_s21 }
  0x56   : > { %372 = vrot.lane.b32.xlu1 %v977_v2, %s830_s20  ;;  %370 = vrot.lane.b32.xlu0 %v979_v3, %s830_s20 }
  0xac   : > { %v265_v7 = vpop.permute.xlu1 %264  ;;  %v258_v8 = vpop.permute.xlu0 %257 }
  0xb0   : > { %v267_v9 = vpop.permute.xlu1 %266  ;;  %v260_v10 = vpop.permute.xlu0 %259 }
  0xb1   : > { %v268_v11 = vsel %vm225_vm0, %v265_v7, %v267_v9  ;;  %v269_v12 = vsel %vm225_vm0, %v267_v9, %v265_v7  ;;  %v262_v13 = vsel %vm261_vm1, %v258_v8, %v260_v10  ;;  %v263_v14 = vsel %vm261_vm1, %v260_v10, %v258_v8 }
  0xb2   : > { %v272_v15 = vsel %vm225_vm0, %v969_v0, %v269_v12  ;;  %v271_v16 = vsel %vm228_vm2, %v973_v1, %v263_v14 }
  0xb3   : > { %v274_v17 = vsub.f32 %v262_v13, %v272_v15  ;;  %v275_v18 = vsub.f32 %v271_v16, %v268_v11 }
  0xb4   : > { %v281_v19 = vpop.permute.xlu1 %280  ;;  %v279_v20 = vpop.permute.xlu0 %278 }
  0xb5   : > { %v276_v21 = vand.u32 2147483647, %v274_v17  ;;  %v277_v22 = vand.u32 2147483647, %v275_v18  ;;  %v283_v23 = vsel %vm261_vm1, %v281_v19, %v279_v20  ;;  %v282_v32 = vsel %vm261_vm1, %v279_v20, %v281_v19 }
  0xb6   : > { %v291_v28 = vsel %vm228_vm2, %v977_v2, %v283_v23 }
  0xb7   : > { %v298_v24 = vadd.f32 %v277_v22, %v276_v21  ;;  %v309_v44 = vmul.f32 %v276_v21, %v276_v21  ;;  %v310_v48 = vmul.f32 %v277_v22, %v277_v22 }
  0xb8   : > { %v287_v25 = vpop.permute.xlu1 %286  ;;  %v285_v26 = vpop.permute.xlu0 %284 }
  0xb9   : > { %v288_v29 = vsel %vm225_vm0, %v285_v26, %v287_v25  ;;  %v289_v30 = vsel %vm225_vm0, %v287_v25, %v285_v26  ;;  %299 = vadd.xlane.f32.xlu0 %v298_v24  ;;  %v311_v59 = vadd.f32 %v310_v48, %v309_v44 }
  0xba   : > { %v292_v33 = vsel %vm225_vm0, %v979_v3, %v289_v30  ;;  %v295_v34 = vsub.f32 %v291_v28, %v288_v29 }
  0xbb   : > { %v294_v35 = vsub.f32 %v282_v32, %v292_v33  ;;  %v831_v32 = vmov 0.0  }
  0xbc   : > { %v297_v36 = vand.u32 2147483647, %v295_v34  ;;  %v345_v37 = vpop.permute.xlu1 %344  ;;  %v343_v38 = vpop.permute.xlu0 %342  ;;  %442 = vst.msk [vmem:[#allocation2] sm:$0xff] %vm441_vm9, %v831_v32 }
  0xbd   : > { %v296_v39 = vand.u32 2147483647, %v294_v35  ;;  %v347_v45 = vsel %vm346_vm3, %v343_v38, %v345_v37  ;;  %v348_v46 = vsel %vm346_vm3, %v345_v37, %v343_v38 }
  0xbe   : > { %v356_v53 = vsel %vm1027_vm4, %v969_v0, %v347_v45  ;;  %v357_v54 = vsel %vm1031_vm5, %v973_v1, %v348_v46  ;;  %v315_v26 = vmul.f32 %v297_v36, %v297_v36 }
  0xbf   : > { %v301_v47 = vadd.f32 %v297_v36, %v296_v39  ;;  %v304_v15 = vmul.f32 %v296_v39, %v276_v21  ;;  %v314_v25 = vmul.f32 %v296_v39, %v296_v39 }
  0xc0   : > { %v352_v49 = vpop.permute.xlu1 %351  ;;  %v350_v50 = vpop.permute.xlu0 %349 }
  0xc1   : > { %v354_v51 = vsel %vm353_vm8, %v350_v50, %v352_v49  ;;  %v355_v52 = vsel %vm353_vm8, %v352_v49, %v350_v50  ;;  %302 = vadd.xlane.f32.xlu1 %v301_v47  ;;  %v316_v27 = vadd.f32 %v315_v26, %v314_v25 }
  0xc2   : > { %v358_v55 = vsel %vm1035_vm6, %v969_v0, %v355_v52  ;;  %v359_v56 = vsel %vm1039_vm7, %v973_v1, %v354_v51  ;;  %v305_v1 = vmul.f32 %v297_v36, %v277_v22 }
  0xc3   : > { %v360_v57 = vsub.f32 %v356_v53, %v358_v55  ;;  %v361_v58 = vsub.f32 %v357_v54, %v359_v56 }
  0xc4   : > { %v367_v60 = vpop.permute.xlu1 %366  ;;  %v365_v61 = vpop.permute.xlu0 %364  ;;  %v306_v23 = vadd.f32 %v305_v1, %v304_v15 }
  0xc5   : > { %v362_v62 = vand.u32 2147483647, %v360_v57  ;;  %v363_v63 = vand.u32 2147483647, %v361_v58  ;;  %312 = vadd.xlane.f32.xlu1 %v311_v59  ;;  %v368_v6 = vsel %vm346_vm3, %v365_v61, %v367_v60  ;;  %v369_v7 = vsel %vm346_vm3, %v367_v60, %v365_v61 }
  0xc6   : > { %v376_v16 = vsel %vm1027_vm4, %v979_v3, %v368_v6  ;;  %v377_v17 = vsel %vm1031_vm5, %v977_v2, %v369_v7 }
  0xc7   : > { %v384_v8 = vadd.f32 %v363_v63, %v362_v62  ;;  %v395_v0 = vmul.f32 %v362_v62, %v362_v62  ;;  %v396_v9 = vmul.f32 %v363_v63, %v363_v63 }
  0xc8   : > { %v373_v10 = vpop.permute.xlu1 %372  ;;  %v371_v11 = vpop.permute.xlu0 %370 }
  0xc9   : > { %v374_v12 = vsel %vm353_vm8, %v371_v11, %v373_v10  ;;  %v375_v13 = vsel %vm353_vm8, %v373_v10, %v371_v11  ;;  %385 = vadd.xlane.f32.xlu0 %v384_v8  ;;  %v397_v14 = vadd.f32 %v396_v9, %v395_v0 }
  0xca   : > { %v378_v18 = vsel %vm1035_vm6, %v979_v3, %v375_v13  ;;  %v379_v5 = vsel %vm1039_vm7, %v977_v2, %v374_v12 }
  0xcb   : > { %v380_v19 = vsub.f32 %v376_v16, %v378_v18  ;;  %v381_v20 = vsub.f32 %v377_v17, %v379_v5  ;;  %398 = vadd.xlane.f32.xlu1 %v397_v14  ;;  %v432_v17 = vshrl.u32 %v222_v4, 7  ;;  %v433_v5 = vstv %s594_s28 }
  0xcd   : > { %v382_v21 = vand.u32 2147483647, %v380_v19  ;;  %v383_v22 = vand.u32 2147483647, %v381_v20 }
  0xcf   : > { %307 = vadd.xlane.f32.xlu1 %v306_v23  ;;  %v387_v24 = vadd.f32 %v383_v22, %v382_v21  ;;  %v400_v28 = vmul.f32 %v382_v21, %v382_v21  ;;  %v401_v29 = vmul.f32 %v383_v22, %v383_v22  ;;  %v390_v30 = vmul.f32 %v382_v21, %v362_v62 }
  0xd0   : > { %v391_v31 = vmul.f32 %v383_v22, %v363_v63  ;;  %v434_v21 = vadd.s32 %v433_v5, %v432_v17 }
  0xd1   : > { %388 = vadd.xlane.f32.xlu0 %v387_v24  ;;  %v402_v3 = vadd.f32 %v401_v29, %v400_v28  ;;  %v443_v28 = vld [vmem:[#allocation2] sm:$0xff] }
  0xd2   : > { %v392_v2 = vadd.f32 %v391_v31, %v390_v30  ;;  %vm435_vm14 = vcmp.lt.s32.totalorder %v434_v21, 8 }
  0xd5   : > { %317 = vadd.xlane.f32.xlu0 %v316_v27 }
  0xd9   : > { %403 = vadd.xlane.f32.xlu0 %v402_v3 }
  0xdd   : > { %393 = vadd.xlane.f32.xlu0 %v392_v2 }
 0x142   : > { %v300_v33 = vpop.xlane.xlu0 %299 }
 0x143   : > { %v322_v37 = vmul.f32 %v300_v33, %v300_v33 }
 0x145   : > { %v323_v41 = vmul.f32 0.00390625, %v322_v37 }
 0x14a   : > { %v303_v34 = vpop.xlane.xlu1 %302 }
 0x14b   : > { %v326_v36 = vmul.f32 %v303_v34, %v303_v34  ;;  %v319_v1 = vmul.f32 %v303_v34, %v300_v33 }
 0x14d   : > { %v327_v42 = vmul.f32 0.00390625, %v326_v36  ;;  %v320_v15 = vmul.f32 0.00390625, %v319_v1 }
 0x14e   : > { %v313_v38 = vpop.xlane.xlu1 %312 }
 0x14f   : > { %v324_v43 = vsub.f32 %v313_v38, %v323_v41 }
 0x151   : > { %v325_v48 = vmax.f32 %v324_v43, 0.0 }
 0x152   : > { %v386_v35 = vpop.xlane.xlu0 %385 }
 0x153   : > { %v408_v39 = vmul.f32 %v386_v35, %v386_v35 }
 0x154   : > { %v399_v49 = vpop.xlane.xlu1 %398 }
 0x155   : > { %v409_v45 = vmul.f32 0.00390625, %v408_v39 }
 0x157   : > { %v410_v52 = vsub.f32 %v399_v49, %v409_v45 }
 0x158   : > { %v308_v13 = vpop.xlane.xlu1 %307 }
 0x159   : > { %v411_v56 = vmax.f32 %v410_v52, 0.0  ;;  %v321_v18 = vsub.f32 %v308_v13, %v320_v15 }
 0x15a   : > { %v389_v40 = vpop.xlane.xlu0 %388 }
 0x15b   : > { %v412_v44 = vmul.f32 %v389_v40, %v389_v40  ;;  %v405_v12 = vmul.f32 %v389_v40, %v386_v35  ;;  %v339_v22 = vadd.f32 1e-08, %v321_v18 }
 0x15d   : > { %v413_v50 = vmul.f32 0.00390625, %v412_v44  ;;  %v406_v16 = vmul.f32 0.00390625, %v405_v12 }
 0x15e   : > { %v318_v46 = vpop.xlane.xlu0 %317 }
 0x15f   : > { %v328_v47 = vsub.f32 %v318_v46, %v327_v42 }
 0x161   : > { %v329_v51 = vmax.f32 %v328_v47, 0.0 }
 0x162   : > { %v404_v53 = vpop.xlane.xlu0 %403 }
 0x163   : > { %v330_v54 = vmul.f32 %v329_v51, %v325_v48  ;;  %v414_v55 = vsub.f32 %v404_v53, %v413_v50 }
 0x165   : > { %675 = vrsqrt.f32 %v330_v54  ;;  %v415_v57 = vmax.f32 %v414_v55, 0.0  ;;  %vm333_vm10 = vcmp.eq.f32.partialorder %v330_v54, inf  ;;  %v336_v61 = vand.u32 2147483648, %v330_v54 }
 0x166   : > { %vm335_vm11 = vcmp.eq.f32.partialorder %v330_v54, 0.0  ;;  %v394_v14 = vpop.xlane.xlu0 %393 }
 0x167   : > { %v416_v58 = vmul.f32 %v415_v57, %v411_v56  ;;  %v407_v19 = vsub.f32 %v394_v14, %v406_v16 }
 0x169   : > { %677 = vrsqrt.f32 %v416_v58  ;;  %vm419_vm12 = vcmp.eq.f32.partialorder %v416_v58, inf  ;;  %v422_v0 = vand.u32 2147483648, %v416_v58  ;;  %vm421_vm13 = vcmp.eq.f32.partialorder %v416_v58, 0.0 }
 0x16a   : > { %v425_v23 = vadd.f32 1e-08, %v407_v19 }
 0x172   : > { %v676_v59 = vpop.eup %675 }
 0x173   : > { %v332_v60 = vmul.f32 %v676_v59, %v330_v54 }
 0x175   : > { %v334_v62 = vsel %vm333_vm10, %v330_v54, %v332_v60 }
 0x176   : > { %v337_v63 = vsel %vm335_vm11, %v336_v61, %v334_v62  ;;  %v678_v6 = vpop.eup %677 }
 0x177   : > { %v418_v7 = vmul.f32 %v678_v6, %v416_v58  ;;  %v338_v8 = vadd.f32 1e-08, %v337_v63 }
 0x179   : > { %v420_v9 = vsel %vm419_vm12, %v416_v58, %v418_v7  ;;  %679 = vrcp.f32 %v338_v8 }
 0x17a   : > { %v423_v10 = vsel %vm421_vm13, %v422_v0, %v420_v9 }
 0x17b   : > { %v424_v11 = vadd.f32 1e-08, %v423_v10 }
 0x17d   : > { %681 = vrcp.f32 %v424_v11 }
 0x186   : > { %v680_v20 = vpop.eup %679 }
 0x187   : > { %v341_v25 = vmul.f32 %v680_v20, %v339_v22 }
 0x18a   : > { %v682_v24 = vpop.eup %681 }
 0x18b   : > { %v427_v26 = vmul.f32 %v682_v24, %v425_v23 }
 0x18d   : > { %v428_v27 = vadd.f32 %v427_v26, %v341_v25 }
 0x18f   : > { %v436_v29 = vsel %vm435_vm14, %v428_v27, 0.0 }
 0x190   : > { %v444_v3 = vadd.f32 %v443_v28, %v436_v29 }
 0x192   : > { %446 = vst.msk [vmem:[#allocation2] sm:$0xff] %vm441_vm9, %v444_v3 }
 0x199   : > { %v450_v4 = vld [vmem:[#allocation2] sm:$0xff] }
 0x19a   : > { %v451_v30 = vsel %vm441_vm9, %v450_v4, 0.0 }
 0x19b   : > { %452 = vadd.xlane.f32.xlu1 %v451_v30 }
 0x224   : > { %v453_v31 = vpop.xlane.xlu1 %452 }
 0x225   : > { %v454_v2 = vrot.slane %v453_v31, 4 }
 0x227   : > { %v455_v32 = vadd.f32 %v454_v2, %v453_v31 }
 0x229   : > { %v456_v33 = vrot.slane %v455_v32, 2 }
 0x22b   : > { %v457_v34 = vadd.f32 %v456_v33, %v455_v32 }
 0x22d   : > { %v458_v35 = vrot.slane %v457_v34, 1 }
 0x22f   : > { %v459_v37 = vadd.f32 %v458_v35, %v457_v34 }
 0x231   : > { %601 = vpush %v459_v37 }
 0x262   : > { %s602_s30 = spop %601 }
 0x263   : > { %v461_v36 = vstv %s602_s30 }
 0x264   : > { %462 = vst [vmem:[%s215_s3] sm:$0xff] %v461_v36 }
 0x265   : > { %752 = shalt.err (!%p749_p6)
}
 0x266   : > { %s753_s18 = scalar_lea.hbm %s475_s26, 128  ;;  %s757_s21 = scalar_lea.hbm %s1138_s2, 256 }
 0x267   : > { %p754_p7 = scmp.ne.s32.totalorder %s475_s26, %s753_s18  ;;  %p758_p4 = scmp.lt.s32.totalorder %s475_s26, %s1138_s2 }
 0x268   : > { %p759_p10 = scmp.lt.s32.totalorder %s757_s21, %s753_s18 }
 0x269   : > { %p755_p1 = pnand %p754_p7, %p899_p9 }
 0x26a   : > { %p760_p8 = por %p759_p10, %p758_p4 }
 0x26b   : > { %p756_p2 = pneg %p755_p1 }
 0x26d   : > { %p761_p0 = pnand %p760_p8, %p756_p2 }
 0x26f   : > { %764 = shalt.err (!%p761_p0)
}
 0x270   : > { %607 = dma.vmem_to_hbm [thread:$0]  (%p899_p9), %s1091_s7, 128, %s475_s26, %s464_s27  }
 0x271 PF: > { %s489_s29 = sand.u32 1, %s803_s9   ;;  %p1153_p3 = scmp.ge.s32.totalorder %s823_s14, 2 }
 0x272   : > { %s490_s3 = scalar_lea.sflag [#allocation5], %s489_s29 }
 0x273   : > { %p617_p13 = pnand %p1153_p3, %p906_p11 }
 0x275   : > { %p618_p5 = pneg %p617_p13 }
 0x277   : > { %798 = dma.done.wait (%p618_p5), %s490_s3, 128  }
 0x278   : > { %800 = vsyncadd (%p618_p5), %s490_s3, 4294967168  ;;  %s21_s14 = sadd.s32 1, %s823_s14   ;;  %s1154_s9 = smov %s807_s10 }
 0x279   : > { %p18_p12 = scmp.ge.s32.totalorder %s21_s14, 4   ;;  %s1155_s10 = smov %s811_s11 }
 0x27a   : > { %s1156_s11 = smov %s904_s23  ;;  %s1157_s12 = smov %s819_s13 }
 0x27b   : > { %s1158_s13 = smov %s1160_s17  ;;  %20 = sbr.rel (!%p18_p12) target bundleno = 8 (0x8), region = 94 }
 0x280   :  { %495 = vsyncpa [#allocation4], 1 }
 0x281   :  { %497 = vsyncpa [#allocation4 + $0x1], 1 }
 0x282   :  { %498 = vsyncpa [#allocation7], 1 }
 0x283   :  { %500 = vsyncpa [#allocation7 + $0x1], 1 }
 0x284   :  { %501 = vsyncpa [#allocation5], 1 }
 0x285   :  { %503 = vsyncpa [#allocation5 + $0x1], 1 }

</bundles_post_ra>
